<compile_context>
chip_gen: v5e
topology: v5e:2x2
jax: 0.10.0
libtpu: 0.0.40
codegen_flags: <defaults>
</compile_context>

<pallas_src>
import functools
import math

import jax
import jax.numpy as jnp
from jax.experimental import pallas as pl
from jax.experimental.pallas import tpu as pltpu


def _round_up(a, b):
    return ((a + b - 1) // b) * b


# ----------------------------------------------------------------------------
# Fused kernel: ALL ResNet flow layers for one (batch, seq-tile) block.
#   per layer l: x = x + tanh(t*wtime_l) * MLP_l([x, h, t])
# x stays resident in vregs across layers; weights are whole-array VMEM blocks
# indexed by a static leading layer axis.
# ----------------------------------------------------------------------------
def _fused_flow_kernel(
    x_ref, h_ref, t_ref,
    w1x_ref, w1h_ref, w1t_ref, b1_ref,
    w2_ref, b2_ref,
    w3_ref, b3_ref,
    wtime_ref,
    o_ref,
    *, n_layers,
):
    ts = t_ref.shape[1]
    t = t_ref[0].astype(jnp.float32)                      # (ts, 1)

    x = x_ref[0].astype(jnp.float32)                      # (sx_blk, dim)
    if x_ref.shape[1] == 1:                               # singleton-seq repeat
        x = jnp.broadcast_to(x, (ts, x.shape[-1]))
    h = h_ref[0].astype(jnp.float32)                      # (sh_blk, dh)
    if h_ref.shape[1] == 1:                               # singleton-seq repeat
        h = jnp.broadcast_to(h, (ts, h.shape[-1]))

    # n_layers is a small compile-time constant -> static unroll.
    for l in range(n_layers):
        # First linear of the MLP over concat([x, h, t], -1), split as two tiny
        # dots + a rank-1 time term (identical math, no lane concat needed).
        z = (
            jnp.dot(x, w1x_ref[l], preferred_element_type=jnp.float32)
            + jnp.dot(h, w1h_ref[l], preferred_element_type=jnp.float32)
            + t * w1t_ref[l]
            + b1_ref[l]
        )
        z = jnp.maximum(z, 0.0)                            # ReLU

        z = jnp.dot(z, w2_ref[l], preferred_element_type=jnp.float32) + b2_ref[l]
        z = jnp.maximum(z, 0.0)                            # ReLU

        net_out = (
            jnp.dot(z, w3_ref[l], preferred_element_type=jnp.float32) + b3_ref[l]
        )

        phi = jnp.tanh(t * wtime_ref[l])                   # TimeTanh (EUP slot)
        x = x + phi * net_out

    o_ref[0] = x.astype(o_ref.dtype)


# ----------------------------------------------------------------------------
# Stack per-layer params on a leading layer axis, natural width, f32.
# ----------------------------------------------------------------------------
def _stack_params(params):
    names = ("w1x", "w1h", "w1t", "b1", "w2", "b2", "w3", "b3", "wtime")
    return {n: jnp.stack([p[n].astype(jnp.float32) for p in params], axis=0)
            for n in names}


# ----------------------------------------------------------------------------
# Padding-aware seq-tile choice.  Prefers (a) >= 2 total grid steps (so both
# v7x TensorCores get work), then (b) minimal seq padding, then (c) the
# largest tile (amortizes ~0.35 us per-grid-step overhead).
# ----------------------------------------------------------------------------
def _choose_seq_tile(seq, batch, max_tile=1024):
    if seq <= 8:
        return seq, seq            # block dim == full array dim: always legal
    cands = {c for c in (1024, 512, 256, 128, 64, 32, 16, 8)
             if c <= _round_up(seq, 8)}
    if seq <= max_tile:
        cands.add(seq)             # full-seq tile (legal even if not mult of 8)
    best = None
    for c in sorted(cands, reverse=True):
        s_pad = _round_up(seq, c)
        steps = batch * (s_pad // c)
        key = (0 if steps >= 2 else 1, s_pad - seq, -c)
        if best is None or key < best[0]:
            best = (key, c, s_pad)
    return best[1], best[2]


# ----------------------------------------------------------------------------
# Parameter construction (deterministic, synthetic)
# ----------------------------------------------------------------------------
def init_resnet_flow_params(key, *, dim, h_dim, hidden_dims, n_layers):
    assert len(hidden_dims) == 2, "example uses two hidden layers"
    h1, h2 = hidden_dims
    params = []
    for layer_idx in range(n_layers):
        k = jax.random.fold_in(key, layer_idx)
        ks = jax.random.split(k, 9)
        scale = 0.2
        params.append(
            dict(
                w1x=scale * jax.random.normal(ks[0], (dim, h1), jnp.float32),
                w1h=scale * jax.random.normal(ks[1], (h_dim, h1), jnp.float32),
                w1t=scale * jax.random.normal(ks[2], (1, h1), jnp.float32),
                b1=scale * jax.random.normal(ks[3], (1, h1), jnp.float32),
                w2=scale * jax.random.normal(ks[4], (h1, h2), jnp.float32),
                b2=scale * jax.random.normal(ks[5], (1, h2), jnp.float32),
                w3=scale * jax.random.normal(ks[6], (h2, dim), jnp.float32),
                b3=scale * jax.random.normal(ks[7], (1, dim), jnp.float32),
                wtime=scale * jax.random.normal(ks[8], (1, dim), jnp.float32),
            )
        )
    return params


# ----------------------------------------------------------------------------
# Full ResNetFlow.forward (single pallas_call for all layers)
# ----------------------------------------------------------------------------
def resnet_flow_forward(x, h, t, params):
    """x: (..., Sx, dim), h: (..., Sh, dh), t: (..., S, 1); Sx, Sh in {1, S}."""
    assert h is not None, "GNeuralFlow ResNetFlow forward requires h"
    orig_dtype = x.dtype
    lead = t.shape[:-2]
    seq = t.shape[-2]
    dim = x.shape[-1]
    dh = h.shape[-1]
    sx = x.shape[-2]
    sh = h.shape[-2]
    assert sx in (1, seq) and sh in (1, seq)
    bt = math.prod(lead) if lead else 1

    x3 = x.reshape(bt, sx, dim)
    h3 = h.reshape(bt, sh, dh)
    t3 = t.reshape(bt, seq, 1)

    w = _stack_params(params)
    n_layers = w["w1x"].shape[0]

    tile_s, s_pad = _choose_seq_tile(seq, bt)
    if s_pad != seq:
        # Padded rows compute garbage (from biases) and are sliced off below.
        t3 = jnp.pad(t3, ((0, 0), (0, s_pad - seq), (0, 0)))
        if sx != 1:
            x3 = jnp.pad(x3, ((0, 0), (0, s_pad - seq), (0, 0)))
        if sh != 1:
            h3 = jnp.pad(h3, ((0, 0), (0, s_pad - seq), (0, 0)))

    grid = (bt, s_pad // tile_s)

    # Singleton-seq broadcast via index_map: always fetch seq-block 0.
    if sx == 1:
        x_spec = pl.BlockSpec((1, 1, dim), lambda b, s: (b, 0, 0))
    else:
        x_spec = pl.BlockSpec((1, tile_s, dim), lambda b, s: (b, s, 0))
    if sh == 1:
        h_spec = pl.BlockSpec((1, 1, dh), lambda b, s: (b, 0, 0))
    else:
        h_spec = pl.BlockSpec((1, tile_s, dh), lambda b, s: (b, s, 0))
    t_spec = pl.BlockSpec((1, tile_s, 1), lambda b, s: (b, s, 0))

    def w_spec(arr):
        # Whole (tiny) weight array, grid-invariant.
        return pl.BlockSpec(arr.shape, lambda b, s: (0, 0, 0))

    kernel = functools.partial(_fused_flow_kernel, n_layers=n_layers)

    out = pl.pallas_call(
        kernel,
        out_shape=jax.ShapeDtypeStruct((bt, s_pad, dim), orig_dtype),
        grid=grid,
        in_specs=[
            x_spec, h_spec, t_spec,
            w_spec(w["w1x"]), w_spec(w["w1h"]), w_spec(w["w1t"]), w_spec(w["b1"]),
            w_spec(w["w2"]), w_spec(w["b2"]),
            w_spec(w["w3"]), w_spec(w["b3"]),
            w_spec(w["wtime"]),
        ],
        out_specs=pl.BlockSpec((1, tile_s, dim), lambda b, s: (b, s, 0)),
        compiler_params=pltpu.CompilerParams(
            dimension_semantics=("parallel", "parallel")
        ),
    )(
        x3, h3, t3,
        w["w1x"], w["w1h"], w["w1t"], w["b1"],
        w["w2"], w["b2"], w["w3"], w["b3"], w["wtime"],
    )

    out = out[:, :seq, :]
    return out.reshape(lead + (seq, dim))


# ----------------------------------------------------------------------------
# Pure-JAX reference for correctness checking
# ----------------------------------------------------------------------------
def resnet_flow_reference(x, h, t, params):
    seq = t.shape[-2]
    if h is not None and h.shape[-2] == 1:
        h = jnp.repeat(h, seq, axis=-2)
    if x.shape[-2] == 1:
        x = jnp.repeat(x, seq, axis=-2)
    for p in params:
        inp1 = x @ p["w1x"] + h @ p["w1h"] + t * p["w1t"] + p["b1"]
        z = jax.nn.relu(inp1)
        z = jax.nn.relu(z @ p["w2"] + p["b2"])
        net_out = z @ p["w3"] + p["b3"]
        phi = jnp.tanh(t * p["wtime"])
        x = x + phi * net_out
    return x


# ----------------------------------------------------------------------------
if __name__ == "__main__":
    key = jax.random.PRNGKey(0)

    # Small shapes consistent with the module: dim=4, hidden_dims=[32,32],
    # n_layers=2, batch=2, seq=8, nfeats(h)=4.
    B, S, DIM, DH = 2, 8, 4, 4
    N_LAYERS = 2
    HIDDEN_DIMS = [32, 32]

    kx, kh, kt, kp = jax.random.split(key, 4)
    # x and h start with a singleton time axis to exercise repeat_interleave.
    x = jax.random.normal(kx, (B, 1, DIM), jnp.float32)
    h = jax.random.normal(kh, (B, 1, DH), jnp.float32)
    t = jax.random.uniform(kt, (B, S, 1), jnp.float32)

    params = init_resnet_flow_params(
        kp, dim=DIM, h_dim=DH, hidden_dims=HIDDEN_DIMS, n_layers=N_LAYERS
    )

    fwd = jax.jit(lambda x_, h_, t_: resnet_flow_forward(x_, h_, t_, params))
    out = jax.block_until_ready(fwd(x, h, t))
    ref = resnet_flow_reference(x, h, t, params)
    assert out.shape == (B, S, DIM)
    assert jnp.allclose(out, ref, atol=1e-5, rtol=1e-5), "mismatch vs reference"

    # Also exercise the non-singleton (full-seq) x path (seq-tiled index_map).
    x_full = jax.random.normal(kx, (B, S, DIM), jnp.float32)
    out2 = jax.block_until_ready(
        jax.jit(lambda a, b, c: resnet_flow_forward(a, b, c, params))(x_full, h, t)
    )
    ref2 = resnet_flow_reference(x_full, h, t, params)
    assert jnp.allclose(out2, ref2, atol=1e-5, rtol=1e-5), "mismatch (full-seq x)"

    print("KERNEL_OK")
</pallas_src>

<mosaic_0001>
module attributes {stable_mosaic.version = 11 : i64} {
  func.func @_fused_flow_kernel(%arg0: i32, %arg1: i32, %arg2: memref<1x1x4xf32, #tpu.memory_space<vmem>>, %arg3: memref<1x1x4xf32, #tpu.memory_space<vmem>>, %arg4: memref<1x8x1xf32, #tpu.memory_space<vmem>>, %arg5: memref<2x4x32xf32, #tpu.memory_space<vmem>>, %arg6: memref<2x4x32xf32, #tpu.memory_space<vmem>>, %arg7: memref<2x1x32xf32, #tpu.memory_space<vmem>>, %arg8: memref<2x1x32xf32, #tpu.memory_space<vmem>>, %arg9: memref<2x32x32xf32, #tpu.memory_space<vmem>>, %arg10: memref<2x1x32xf32, #tpu.memory_space<vmem>>, %arg11: memref<2x32x4xf32, #tpu.memory_space<vmem>>, %arg12: memref<2x1x4xf32, #tpu.memory_space<vmem>>, %arg13: memref<2x1x4xf32, #tpu.memory_space<vmem>>, %arg14: memref<1x8x4xf32, #tpu.memory_space<vmem>>) attributes {dimension_semantics = [#tpu.dimension_semantics<parallel>, #tpu.dimension_semantics<parallel>], iteration_bounds = array<i64: 2, 1>, scalar_prefetch = 0 : i64, scratch_operands = 0 : i64, tpu.core_type = #tpu.core_type<tc>, window_params = [{transform_indices = @transform_0, window_bounds = array<i64: 1, 1, 4>}, {transform_indices = @transform_1, window_bounds = array<i64: 1, 1, 4>}, {transform_indices = @transform_2, window_bounds = array<i64: 1, 8, 1>}, {pipeline_mode = #tpu.pipeline_mode<synchronous>, transform_indices = @transform_3, window_bounds = array<i64: 2, 4, 32>}, {pipeline_mode = #tpu.pipeline_mode<synchronous>, transform_indices = @transform_4, window_bounds = array<i64: 2, 4, 32>}, {pipeline_mode = #tpu.pipeline_mode<synchronous>, transform_indices = @transform_5, window_bounds = array<i64: 2, 1, 32>}, {pipeline_mode = #tpu.pipeline_mode<synchronous>, transform_indices = @transform_6, window_bounds = array<i64: 2, 1, 32>}, {pipeline_mode = #tpu.pipeline_mode<synchronous>, transform_indices = @transform_7, window_bounds = array<i64: 2, 32, 32>}, {pipeline_mode = #tpu.pipeline_mode<synchronous>, transform_indices = @transform_8, window_bounds = array<i64: 2, 1, 32>}, {pipeline_mode = #tpu.pipeline_mode<synchronous>, transform_indices = @transform_9, window_bounds = array<i64: 2, 32, 4>}, {pipeline_mode = #tpu.pipeline_mode<synchronous>, transform_indices = @transform_10, window_bounds = array<i64: 2, 1, 4>}, {pipeline_mode = #tpu.pipeline_mode<synchronous>, transform_indices = @transform_11, window_bounds = array<i64: 2, 1, 4>}, {transform_indices = @transform_12, window_bounds = array<i64: 1, 8, 4>}]} {
    %c0 = arith.constant 0 : index
    %c0_0 = arith.constant 0 : index
    %c0_1 = arith.constant 0 : index
    %0 = vector.load %arg4[%c0, %c0_0, %c0_1] : memref<1x8x1xf32, #tpu.memory_space<vmem>>, vector<1x8x1xf32>
    %1 = vector.shape_cast %0 : vector<1x8x1xf32> to vector<8x1xf32>
    %c0_2 = arith.constant 0 : index
    %c0_3 = arith.constant 0 : index
    %c0_4 = arith.constant 0 : index
    %2 = vector.load %arg2[%c0_2, %c0_3, %c0_4] : memref<1x1x4xf32, #tpu.memory_space<vmem>>, vector<1x1x4xf32>
    %3 = vector.shape_cast %2 : vector<1x1x4xf32> to vector<1x4xf32>
    %4 = vector.shape_cast %3 : vector<1x4xf32> to vector<1x4xf32>
    %5 = vector.broadcast %4 : vector<1x4xf32> to vector<8x4xf32>
    %c0_5 = arith.constant 0 : index
    %c0_6 = arith.constant 0 : index
    %c0_7 = arith.constant 0 : index
    %6 = vector.load %arg3[%c0_5, %c0_6, %c0_7] : memref<1x1x4xf32, #tpu.memory_space<vmem>>, vector<1x1x4xf32>
    %7 = vector.shape_cast %6 : vector<1x1x4xf32> to vector<1x4xf32>
    %8 = vector.shape_cast %7 : vector<1x4xf32> to vector<1x4xf32>
    %9 = vector.broadcast %8 : vector<1x4xf32> to vector<8x4xf32>
    %c0_8 = arith.constant 0 : index
    %c0_9 = arith.constant 0 : index
    %c0_10 = arith.constant 0 : index
    %10 = vector.load %arg5[%c0_8, %c0_9, %c0_10] : memref<2x4x32xf32, #tpu.memory_space<vmem>>, vector<1x4x32xf32>
    %11 = vector.shape_cast %10 : vector<1x4x32xf32> to vector<4x32xf32>
    %cst = arith.constant dense<0.000000e+00> : vector<8x32xf32>
    %12 = tpu.matmul %5, %11, %cst {dimension_numbers = #tpu.dot_dimension_numbers<[1], [0], [0], [1], [0, 0, 1, 1], [], []>} : vector<8x4xf32>, vector<4x32xf32>, vector<8x32xf32> -> vector<8x32xf32>
    %c0_11 = arith.constant 0 : index
    %c0_12 = arith.constant 0 : index
    %c0_13 = arith.constant 0 : index
    %13 = vector.load %arg6[%c0_11, %c0_12, %c0_13] : memref<2x4x32xf32, #tpu.memory_space<vmem>>, vector<1x4x32xf32>
    %14 = vector.shape_cast %13 : vector<1x4x32xf32> to vector<4x32xf32>
    %cst_14 = arith.constant dense<0.000000e+00> : vector<8x32xf32>
    %15 = tpu.matmul %9, %14, %cst_14 {dimension_numbers = #tpu.dot_dimension_numbers<[1], [0], [0], [1], [0, 0, 1, 1], [], []>} : vector<8x4xf32>, vector<4x32xf32>, vector<8x32xf32> -> vector<8x32xf32>
    %16 = arith.addf %12, %15 : vector<8x32xf32>
    %c0_15 = arith.constant 0 : index
    %c0_16 = arith.constant 0 : index
    %c0_17 = arith.constant 0 : index
    %17 = vector.load %arg7[%c0_15, %c0_16, %c0_17] : memref<2x1x32xf32, #tpu.memory_space<vmem>>, vector<1x1x32xf32>
    %18 = vector.shape_cast %17 : vector<1x1x32xf32> to vector<1x32xf32>
    %19 = vector.broadcast %1 : vector<8x1xf32> to vector<8x32xf32>
    %20 = vector.broadcast %18 : vector<1x32xf32> to vector<8x32xf32>
    %21 = arith.mulf %19, %20 : vector<8x32xf32>
    %22 = arith.addf %16, %21 : vector<8x32xf32>
    %c0_18 = arith.constant 0 : index
    %c0_19 = arith.constant 0 : index
    %c0_20 = arith.constant 0 : index
    %23 = vector.load %arg8[%c0_18, %c0_19, %c0_20] : memref<2x1x32xf32, #tpu.memory_space<vmem>>, vector<1x1x32xf32>
    %24 = vector.shape_cast %23 : vector<1x1x32xf32> to vector<1x32xf32>
    %25 = vector.broadcast %24 : vector<1x32xf32> to vector<8x32xf32>
    %26 = arith.addf %22, %25 : vector<8x32xf32>
    %cst_21 = arith.constant 0.000000e+00 : f32
    %27 = vector.broadcast %cst_21 : f32 to vector<8x32xf32>
    %28 = arith.maximumf %26, %27 : vector<8x32xf32>
    %c0_22 = arith.constant 0 : index
    %c0_23 = arith.constant 0 : index
    %c0_24 = arith.constant 0 : index
    %29 = vector.load %arg9[%c0_22, %c0_23, %c0_24] : memref<2x32x32xf32, #tpu.memory_space<vmem>>, vector<1x32x32xf32>
    %30 = vector.shape_cast %29 : vector<1x32x32xf32> to vector<32x32xf32>
    %cst_25 = arith.constant dense<0.000000e+00> : vector<8x32xf32>
    %31 = tpu.matmul %28, %30, %cst_25 {dimension_numbers = #tpu.dot_dimension_numbers<[1], [0], [0], [1], [0, 0, 1, 1], [], []>} : vector<8x32xf32>, vector<32x32xf32>, vector<8x32xf32> -> vector<8x32xf32>
    %c0_26 = arith.constant 0 : index
    %c0_27 = arith.constant 0 : index
    %c0_28 = arith.constant 0 : index
    %32 = vector.load %arg10[%c0_26, %c0_27, %c0_28] : memref<2x1x32xf32, #tpu.memory_space<vmem>>, vector<1x1x32xf32>
    %33 = vector.shape_cast %32 : vector<1x1x32xf32> to vector<1x32xf32>
    %34 = vector.broadcast %33 : vector<1x32xf32> to vector<8x32xf32>
    %35 = arith.addf %31, %34 : vector<8x32xf32>
    %cst_29 = arith.constant 0.000000e+00 : f32
    %36 = vector.broadcast %cst_29 : f32 to vector<8x32xf32>
    %37 = arith.maximumf %35, %36 : vector<8x32xf32>
    %c0_30 = arith.constant 0 : index
    %c0_31 = arith.constant 0 : index
    %c0_32 = arith.constant 0 : index
    %38 = vector.load %arg11[%c0_30, %c0_31, %c0_32] : memref<2x32x4xf32, #tpu.memory_space<vmem>>, vector<1x32x4xf32>
    %39 = vector.shape_cast %38 : vector<1x32x4xf32> to vector<32x4xf32>
    %cst_33 = arith.constant dense<0.000000e+00> : vector<8x4xf32>
    %40 = tpu.matmul %37, %39, %cst_33 {dimension_numbers = #tpu.dot_dimension_numbers<[1], [0], [0], [1], [0, 0, 1, 1], [], []>} : vector<8x32xf32>, vector<32x4xf32>, vector<8x4xf32> -> vector<8x4xf32>
    %c0_34 = arith.constant 0 : index
    %c0_35 = arith.constant 0 : index
    %c0_36 = arith.constant 0 : index
    %41 = vector.load %arg12[%c0_34, %c0_35, %c0_36] : memref<2x1x4xf32, #tpu.memory_space<vmem>>, vector<1x1x4xf32>
    %42 = vector.shape_cast %41 : vector<1x1x4xf32> to vector<1x4xf32>
    %43 = vector.broadcast %42 : vector<1x4xf32> to vector<8x4xf32>
    %44 = arith.addf %40, %43 : vector<8x4xf32>
    %c0_37 = arith.constant 0 : index
    %c0_38 = arith.constant 0 : index
    %c0_39 = arith.constant 0 : index
    %45 = vector.load %arg13[%c0_37, %c0_38, %c0_39] : memref<2x1x4xf32, #tpu.memory_space<vmem>>, vector<1x1x4xf32>
    %46 = vector.shape_cast %45 : vector<1x1x4xf32> to vector<1x4xf32>
    %47 = vector.broadcast %1 : vector<8x1xf32> to vector<8x4xf32>
    %48 = vector.broadcast %46 : vector<1x4xf32> to vector<8x4xf32>
    %49 = arith.mulf %47, %48 : vector<8x4xf32>
    %50 = math.tanh %49 : vector<8x4xf32>
    %51 = arith.mulf %50, %44 : vector<8x4xf32>
    %52 = arith.addf %5, %51 : vector<8x4xf32>
    %c1 = arith.constant 1 : index
    %c0_40 = arith.constant 0 : index
    %c0_41 = arith.constant 0 : index
    %53 = vector.load %arg5[%c1, %c0_40, %c0_41] : memref<2x4x32xf32, #tpu.memory_space<vmem>>, vector<1x4x32xf32>
    %54 = vector.shape_cast %53 : vector<1x4x32xf32> to vector<4x32xf32>
    %cst_42 = arith.constant dense<0.000000e+00> : vector<8x32xf32>
    %55 = tpu.matmul %52, %54, %cst_42 {dimension_numbers = #tpu.dot_dimension_numbers<[1], [0], [0], [1], [0, 0, 1, 1], [], []>} : vector<8x4xf32>, vector<4x32xf32>, vector<8x32xf32> -> vector<8x32xf32>
    %c1_43 = arith.constant 1 : index
    %c0_44 = arith.constant 0 : index
    %c0_45 = arith.constant 0 : index
    %56 = vector.load %arg6[%c1_43, %c0_44, %c0_45] : memref<2x4x32xf32, #tpu.memory_space<vmem>>, vector<1x4x32xf32>
    %57 = vector.shape_cast %56 : vector<1x4x32xf32> to vector<4x32xf32>
    %cst_46 = arith.constant dense<0.000000e+00> : vector<8x32xf32>
    %58 = tpu.matmul %9, %57, %cst_46 {dimension_numbers = #tpu.dot_dimension_numbers<[1], [0], [0], [1], [0, 0, 1, 1], [], []>} : vector<8x4xf32>, vector<4x32xf32>, vector<8x32xf32> -> vector<8x32xf32>
    %59 = arith.addf %55, %58 : vector<8x32xf32>
    %c1_47 = arith.constant 1 : index
    %c0_48 = arith.constant 0 : index
    %c0_49 = arith.constant 0 : index
    %60 = vector.load %arg7[%c1_47, %c0_48, %c0_49] : memref<2x1x32xf32, #tpu.memory_space<vmem>>, vector<1x1x32xf32>
    %61 = vector.shape_cast %60 : vector<1x1x32xf32> to vector<1x32xf32>
    %62 = vector.broadcast %1 : vector<8x1xf32> to vector<8x32xf32>
    %63 = vector.broadcast %61 : vector<1x32xf32> to vector<8x32xf32>
    %64 = arith.mulf %62, %63 : vector<8x32xf32>
    %65 = arith.addf %59, %64 : vector<8x32xf32>
    %c1_50 = arith.constant 1 : index
    %c0_51 = arith.constant 0 : index
    %c0_52 = arith.constant 0 : index
    %66 = vector.load %arg8[%c1_50, %c0_51, %c0_52] : memref<2x1x32xf32, #tpu.memory_space<vmem>>, vector<1x1x32xf32>
    %67 = vector.shape_cast %66 : vector<1x1x32xf32> to vector<1x32xf32>
    %68 = vector.broadcast %67 : vector<1x32xf32> to vector<8x32xf32>
    %69 = arith.addf %65, %68 : vector<8x32xf32>
    %cst_53 = arith.constant 0.000000e+00 : f32
    %70 = vector.broadcast %cst_53 : f32 to vector<8x32xf32>
    %71 = arith.maximumf %69, %70 : vector<8x32xf32>
    %c1_54 = arith.constant 1 : index
    %c0_55 = arith.constant 0 : index
    %c0_56 = arith.constant 0 : index
    %72 = vector.load %arg9[%c1_54, %c0_55, %c0_56] : memref<2x32x32xf32, #tpu.memory_space<vmem>>, vector<1x32x32xf32>
    %73 = vector.shape_cast %72 : vector<1x32x32xf32> to vector<32x32xf32>
    %cst_57 = arith.constant dense<0.000000e+00> : vector<8x32xf32>
    %74 = tpu.matmul %71, %73, %cst_57 {dimension_numbers = #tpu.dot_dimension_numbers<[1], [0], [0], [1], [0, 0, 1, 1], [], []>} : vector<8x32xf32>, vector<32x32xf32>, vector<8x32xf32> -> vector<8x32xf32>
    %c1_58 = arith.constant 1 : index
    %c0_59 = arith.constant 0 : index
    %c0_60 = arith.constant 0 : index
    %75 = vector.load %arg10[%c1_58, %c0_59, %c0_60] : memref<2x1x32xf32, #tpu.memory_space<vmem>>, vector<1x1x32xf32>
    %76 = vector.shape_cast %75 : vector<1x1x32xf32> to vector<1x32xf32>
    %77 = vector.broadcast %76 : vector<1x32xf32> to vector<8x32xf32>
    %78 = arith.addf %74, %77 : vector<8x32xf32>
    %cst_61 = arith.constant 0.000000e+00 : f32
    %79 = vector.broadcast %cst_61 : f32 to vector<8x32xf32>
    %80 = arith.maximumf %78, %79 : vector<8x32xf32>
    %c1_62 = arith.constant 1 : index
    %c0_63 = arith.constant 0 : index
    %c0_64 = arith.constant 0 : index
    %81 = vector.load %arg11[%c1_62, %c0_63, %c0_64] : memref<2x32x4xf32, #tpu.memory_space<vmem>>, vector<1x32x4xf32>
    %82 = vector.shape_cast %81 : vector<1x32x4xf32> to vector<32x4xf32>
    %cst_65 = arith.constant dense<0.000000e+00> : vector<8x4xf32>
    %83 = tpu.matmul %80, %82, %cst_65 {dimension_numbers = #tpu.dot_dimension_numbers<[1], [0], [0], [1], [0, 0, 1, 1], [], []>} : vector<8x32xf32>, vector<32x4xf32>, vector<8x4xf32> -> vector<8x4xf32>
    %c1_66 = arith.constant 1 : index
    %c0_67 = arith.constant 0 : index
    %c0_68 = arith.constant 0 : index
    %84 = vector.load %arg12[%c1_66, %c0_67, %c0_68] : memref<2x1x4xf32, #tpu.memory_space<vmem>>, vector<1x1x4xf32>
    %85 = vector.shape_cast %84 : vector<1x1x4xf32> to vector<1x4xf32>
    %86 = vector.broadcast %85 : vector<1x4xf32> to vector<8x4xf32>
    %87 = arith.addf %83, %86 : vector<8x4xf32>
    %c1_69 = arith.constant 1 : index
    %c0_70 = arith.constant 0 : index
    %c0_71 = arith.constant 0 : index
    %88 = vector.load %arg13[%c1_69, %c0_70, %c0_71] : memref<2x1x4xf32, #tpu.memory_space<vmem>>, vector<1x1x4xf32>
    %89 = vector.shape_cast %88 : vector<1x1x4xf32> to vector<1x4xf32>
    %90 = vector.broadcast %1 : vector<8x1xf32> to vector<8x4xf32>
    %91 = vector.broadcast %89 : vector<1x4xf32> to vector<8x4xf32>
    %92 = arith.mulf %90, %91 : vector<8x4xf32>
    %93 = math.tanh %92 : vector<8x4xf32>
    %94 = arith.mulf %93, %87 : vector<8x4xf32>
    %95 = arith.addf %52, %94 : vector<8x4xf32>
    %c0_72 = arith.constant 0 : index
    %c0_73 = arith.constant 0 : index
    %c0_74 = arith.constant 0 : index
    %96 = vector.load %arg14[%c0_72, %c0_73, %c0_74] : memref<1x8x4xf32, #tpu.memory_space<vmem>>, vector<1x8x4xf32>
    %97 = vector.shape_cast %96 : vector<1x8x4xf32> to vector<8x4xf32>
    %98 = vector.shape_cast %95 : vector<8x4xf32> to vector<1x8x4xf32>
    tpu.vector_store %arg14[%c0_72, %c0_73, %c0_74], %98 {strides = array<i32>} : memref<1x8x4xf32, #tpu.memory_space<vmem>>, vector<1x8x4xf32>,
    return
  }
  func.func @transform_0(%arg0: i32, %arg1: i32) -> (i32, i32, i32) {
    %c0_i32 = arith.constant 0 : i32
    %c0_i32_0 = arith.constant 0 : i32
    %c0_i32_1 = arith.constant 0 : i32
    return %arg0, %c0_i32, %c0_i32_0 : i32, i32, i32
  }
  func.func @transform_1(%arg0: i32, %arg1: i32) -> (i32, i32, i32) {
    %c0_i32 = arith.constant 0 : i32
    %c0_i32_0 = arith.constant 0 : i32
    %c0_i32_1 = arith.constant 0 : i32
    return %arg0, %c0_i32, %c0_i32_0 : i32, i32, i32
  }
  func.func @transform_2(%arg0: i32, %arg1: i32) -> (i32, i32, i32) {
    %c0_i32 = arith.constant 0 : i32
    %c0_i32_0 = arith.constant 0 : i32
    return %arg0, %arg1, %c0_i32 : i32, i32, i32
  }
  func.func @transform_3(%arg0: i32, %arg1: i32) -> (i32, i32, i32) {
    %c0_i32 = arith.constant 0 : i32
    %c0_i32_0 = arith.constant 0 : i32
    %c0_i32_1 = arith.constant 0 : i32
    %c0_i32_2 = arith.constant 0 : i32
    return %c0_i32, %c0_i32_0, %c0_i32_1 : i32, i32, i32
  }
  func.func @transform_4(%arg0: i32, %arg1: i32) -> (i32, i32, i32) {
    %c0_i32 = arith.constant 0 : i32
    %c0_i32_0 = arith.constant 0 : i32
    %c0_i32_1 = arith.constant 0 : i32
    %c0_i32_2 = arith.constant 0 : i32
    return %c0_i32, %c0_i32_0, %c0_i32_1 : i32, i32, i32
  }
  func.func @transform_5(%arg0: i32, %arg1: i32) -> (i32, i32, i32) {
    %c0_i32 = arith.constant 0 : i32
    %c0_i32_0 = arith.constant 0 : i32
    %c0_i32_1 = arith.constant 0 : i32
    %c0_i32_2 = arith.constant 0 : i32
    return %c0_i32, %c0_i32_0, %c0_i32_1 : i32, i32, i32
  }
  func.func @transform_6(%arg0: i32, %arg1: i32) -> (i32, i32, i32) {
    %c0_i32 = arith.constant 0 : i32
    %c0_i32_0 = arith.constant 0 : i32
    %c0_i32_1 = arith.constant 0 : i32
    %c0_i32_2 = arith.constant 0 : i32
    return %c0_i32, %c0_i32_0, %c0_i32_1 : i32, i32, i32
  }
  func.func @transform_7(%arg0: i32, %arg1: i32) -> (i32, i32, i32) {
    %c0_i32 = arith.constant 0 : i32
    %c0_i32_0 = arith.constant 0 : i32
    %c0_i32_1 = arith.constant 0 : i32
    %c0_i32_2 = arith.constant 0 : i32
    return %c0_i32, %c0_i32_0, %c0_i32_1 : i32, i32, i32
  }
  func.func @transform_8(%arg0: i32, %arg1: i32) -> (i32, i32, i32) {
    %c0_i32 = arith.constant 0 : i32
    %c0_i32_0 = arith.constant 0 : i32
    %c0_i32_1 = arith.constant 0 : i32
    %c0_i32_2 = arith.constant 0 : i32
    return %c0_i32, %c0_i32_0, %c0_i32_1 : i32, i32, i32
  }
  func.func @transform_9(%arg0: i32, %arg1: i32) -> (i32, i32, i32) {
    %c0_i32 = arith.constant 0 : i32
    %c0_i32_0 = arith.constant 0 : i32
    %c0_i32_1 = arith.constant 0 : i32
    %c0_i32_2 = arith.constant 0 : i32
    return %c0_i32, %c0_i32_0, %c0_i32_1 : i32, i32, i32
  }
  func.func @transform_10(%arg0: i32, %arg1: i32) -> (i32, i32, i32) {
    %c0_i32 = arith.constant 0 : i32
    %c0_i32_0 = arith.constant 0 : i32
    %c0_i32_1 = arith.constant 0 : i32
    %c0_i32_2 = arith.constant 0 : i32
    return %c0_i32, %c0_i32_0, %c0_i32_1 : i32, i32, i32
  }
  func.func @transform_11(%arg0: i32, %arg1: i32) -> (i32, i32, i32) {
    %c0_i32 = arith.constant 0 : i32
    %c0_i32_0 = arith.constant 0 : i32
    %c0_i32_1 = arith.constant 0 : i32
    %c0_i32_2 = arith.constant 0 : i32
    return %c0_i32, %c0_i32_0, %c0_i32_1 : i32, i32, i32
  }
  func.func @transform_12(%arg0: i32, %arg1: i32) -> (i32, i32, i32) {
    %c0_i32 = arith.constant 0 : i32
    %c0_i32_0 = arith.constant 0 : i32
    return %arg0, %arg1, %c0_i32 : i32, i32, i32
  }
}

</mosaic_0001>

<bundles_post_ra>
// kernel: _lambda_.1
= control target key start
LH: loop header
LB: loop body
LE: loop exit
PB: predicated region body
PF: predicated region fallthrough
CT: control target
= control target key end

     0   :  { %s1629_s0 = inlined_call_operand.vmem [shape: f32[2,1,4], index: 0, kind: input, shape index: {}]   ;;  %s1630_s1 = inlined_call_operand.hbm [shape: f32[2,1,4], index: 1, kind: input, shape index: {}]   ;;  %s1631_s2 = inlined_call_operand.vmem [shape: f32[2,8,1], index: 2, kind: input, shape index: {}]   ;;  %s1632_s3 = inlined_call_operand.vmem [shape: f32[2,4,32], index: 3, kind: input, shape index: {}]   ;;  %s1633_s4 = inlined_call_operand.vmem [shape: f32[2,4,32], index: 4, kind: input, shape index: {}]   ;;  %s1634_s5 = inlined_call_operand.hbm [shape: f32[2,1,32], index: 5, kind: input, shape index: {}]   ;;  %s1635_s6 = inlined_call_operand.hbm [shape: f32[2,1,32], index: 6, kind: input, shape index: {}]   ;;  %s1636_s7 = inlined_call_operand.hbm [shape: f32[2,32,32], index: 7, kind: input, shape index: {}]   ;;  %s1637_s8 = inlined_call_operand.vmem [shape: f32[2,1,32], index: 8, kind: input, shape index: {}]   ;;  %s1638_s9 = inlined_call_operand.hbm [shape: f32[2,32,4], index: 9, kind: input, shape index: {}]   ;;  %s1639_s10 = inlined_call_operand.vmem [shape: f32[2,1,4], index: 10, kind: input, shape index: {}]   ;;  %s1640_s11 = inlined_call_operand.vmem [shape: f32[2,1,4], index: 11, kind: input, shape index: {}]   ;;  %s1641_s12 = inlined_call_operand.vmem [shape: f32[2,8,4], index: 12, kind: output, shape index: {}]  }
   0x1   :  { %1644 = sst [smem:[#allocation13_spill]] %s1634_s5 }
   0x2   :  { %1645 = sst [smem:[#allocation14_spill]] %s1636_s7 }
   0x3   :  { %1646 = sst [smem:[#allocation15_spill]] %s1639_s10 }
   0x4   :  { %1647 = sst [smem:[#allocation16_spill]] %s1640_s11 }
   0x5   :  { %1648 = sst [smem:[#allocation17_spill]] %s1641_s12 }
   0x6   :  { %17 = vsyncpa [#allocation3], 0 }
   0x7   :  { %19 = vsyncpa [#allocation3 + $0x1], 0 }
   0x8   :  { %20 = vsyncpa [#allocation5], 0 }
   0x9   :  { %21 = vsyncpa [#allocation8], 0  ;;  %s1427_s21 = smov 0   ;;  %s1429_s22 = smov 0  }
   0xa   :  { %s1431_s23 = smov 0   ;;  %s1433_s24 = smov 0  }
   0xb   :  { %s1435_s25 = smov 0   ;;  %s1437_s26 = smov 0  }
   0xc LB: > { %s991_s27 = sadd.s32 4294967295, %s1351_s26   ;;  %p993_p0 = scmp.ge.s32.totalorder %s1351_s26, 1  ;;  %s1351_s26 = sphi %s1437_s26, %s27_s26   ;;  %s1347_s25 = sphi %s1435_s25, %s1663_s25   ;;  %s1343_s24 = sphi %s1433_s24, %s1662_s24   ;;  %s1339_s23 = sphi %s1431_s23, %s1661_s23   ;;  %s1335_s22 = sphi %s1429_s22, %s1660_s22   ;;  %s1331_s21 = sphi %s1427_s21, %s1659_s21  }
   0xd   : > { %p1459_p1 = scmp.eq.s32.totalorder %s991_s27, 0  ;;  %p341_p2 = scmp.lt.s32.totalorder %s1351_s26, 3 }
   0xe   : > { %s1650_s5 = sld [smem:[#allocation13_spill]]  ;;  %s1353_s15 = smov [#allocation4]  }
   0xf   : > { %p1467_p3 = pnand %p993_p0, %p341_p2  ;;  %s360_s16 = sshll.u32 %s1353_s15, 4  ;;  %s361_s16 = int_to_ptr.vmem [resolvable:$true] %s360_s16 }
  0x10   : > { %s1653_s7 = sld [smem:[#allocation14_spill]]  ;;  %s1354_s27 = smov 16  }
  0x11   : > { %p1043_p4 = pneg %p1467_p3  ;;  %s1355_s29 = smov 1  }
  0x12   : > { %s1356_s30 = smov [#allocation7]   ;;  %s1358_s12 = smov 8  }
  0x13   : > { %p1475_p5 = pnand %p1043_p4, %p1459_p1  ;;  %s388_s15 = sshll.u32 %s1356_s30, 4  ;;  %s389_s15 = int_to_ptr.vmem [resolvable:$true] %s388_s15 }
  0x14   : > { %s358_s13 = sshll.u32 %s1650_s5, 4  ;;  %s1357_s5 = smov 128   ;;  %s359_s13 = int_to_ptr.hbm [resolvable:$true] %s358_s13 }
  0x15   : > { %1046 = dma.hbm_to_vmem [thread:$0]  (!%p1475_p5), %s359_s13, 32, %s361_s16, [#allocation5], %s1354_s27, %s1354_s27, %s1355_s29  }
  0x16   : > { %s386_s20 = sshll.u32 %s1653_s7, 4  ;;  %s372_s7 = sshll.u32 %s1635_s6, 4  ;;  %s387_s20 = int_to_ptr.hbm [resolvable:$true] %s386_s20  ;;  %s373_s7 = int_to_ptr.hbm [resolvable:$true] %s372_s7 }
  0x17   : > { %1052 = dma.hbm_to_vmem [thread:$0]  (!%p1475_p5), %s387_s20, 1024, %s389_s15, [#allocation8], %s1357_s5, %s1357_s5, %s1358_s12  }
  0x18   : > { %s1359_s13 = smov [#allocation6]   ;;  %s403_s11 = sshll.u32 %s1638_s9, 4  ;;  %s404_s11 = int_to_ptr.hbm [resolvable:$true] %s403_s11 }
  0x19   : > { %s374_s16 = sshll.u32 %s1359_s13, 4  ;;  %s1360_s20 = smov [#allocation9]   ;;  %s375_s16 = int_to_ptr.vmem [resolvable:$true] %s374_s16 }
  0x1a   : > { %1049 = dma.hbm_to_vmem [thread:$0]  (!%p1475_p5), %s373_s7, 32, %s375_s16, [#allocation5], %s1354_s27, %s1354_s27, %s1355_s29  }
  0x1b   : > { %s405_s15 = sshll.u32 %s1360_s20, 4  ;;  %s39_s18 = sadd.s32 1, %s1347_s25  ;;  %s406_s15 = int_to_ptr.vmem [resolvable:$true] %s405_s15 }
  0x1c   : > { %1055 = dma.hbm_to_vmem [thread:$0]  (!%p1475_p5), %s404_s11, 1024, %s406_s15, [#allocation8], %s1357_s5, %s1357_s5, %s1358_s12  }
  0x1d   : > { %s72_s19 = sadd.s32 1, %s1339_s23  ;;  %p41_p6 = scmp.ge.s32.totalorder %s39_s18, 2 }
  0x1e   : > { %p79_p7 = scmp.ne.s32.totalorder %s1339_s23, %s1335_s22  ;;  %p80_p8 = scmp.eq.s32.totalorder %s1351_s26, 0 }
  0x1f   : > { %p85_p9 = scmp.ne.s32.totalorder %s1335_s22, %s1331_s21  ;;  %s1665_s18 = smov (%p41_p6, %s39_s18), 0 }
  0x20   : > { %p1505_p10 = por %p80_p8, %p79_p7  ;;  %s69_s5 = ssub.s32 %s1347_s25, %s1665_s18 }
  0x21   : > { %p1511_p11 = por %p1459_p1, %p85_p9  ;;  %p1064_p12 = scmp.lt.s32.totalorder %s1351_s26, 2 }
  0x22   : > { %p70_p13 = scmp.eq.s32.totalorder %s69_s5, 0  ;;  %s431_s11 = sand.u32 1, %s1339_s23  }
  0x23   : > { %s437_s27 = scalar_lea.hbm %s1630_s1, %s1347_s25  ;;  %s434_s29 = scalar_lea.vmem [#allocation2], %s431_s11 }
  0x24   : > { %s1520_s12 = scalar_select %p70_p13, %s1339_s23, %s72_s19  }
  0x25   : > { %s441_s13 = sshll.u32 %s434_s29, 4  ;;  %s439_s16 = sshll.u32 %s437_s27, 4  ;;  %s442_s13 = int_to_ptr.vmem [resolvable:$true] %s441_s13  ;;  %s440_s16 = int_to_ptr.hbm [resolvable:$true] %s439_s16 }
  0x26   : > { %p1057_p0 = pnand %p1064_p12, %p1505_p10  ;;  %s432_s30 = scalar_lea.sflag [#allocation3], %s431_s11 }
  0x27   : > { %460 = sbr.rel (%p1467_p3) target bundleno = 871 (0x367), region = 68  ;;  %s462_s20 = sand.u32 (!%p1467_p3), 1, %s1335_s22  }
  0x28   : > { %1059 = dma.hbm_to_vmem [thread:$0]  (!%p1057_p0), %s440_s16, 16, %s442_s13, %s432_s30  }
  0x29   : > { %s463_s15 = scalar_lea.sflag (!%p1467_p3), [#allocation3], %s462_s20  ;;  %s465_s19 = scalar_lea.vmem (!%p1467_p3), [#allocation2], %s462_s20 }
  0x2c   : > { %1318 = dma.done.wait (%p1511_p11), %s463_s15, 16  }
  0x2d   : > { %1320 = vsyncadd (%p1511_p11), %s463_s15, 4294967280 }
  0x2e   : > { %1322 = dma.done.wait (%p1459_p1), [#allocation5], 64  }
  0x2f   : > { %1324 = vsyncadd (%p1459_p1), [#allocation5], 4294967232 }
  0x30   : > { %1326 = dma.done.wait (%p1459_p1), [#allocation8], 2048  }
  0x31   : > { %1328 = vsyncadd (%p1459_p1), [#allocation8], 4294965248  ;;  %p538_p2 = scmp.lt.s32.totalorder %s1343_s24, 1  ;;  %v1361_v0 = vmov 0   ;;  %vm568_vm0 = vcmask 1043456   ;;  %vm565_vm1 = vcmask 31744  }
  0x32   : > { %1126 = vset.pattern.permute.xlu0 %v1361_v0  ;;  %v564_v1 = vld [vmem:[%s1633_s4] sm:$0xf]  ;;  %v636_v7 = vld [vmem:[#allocation7 + $0x10] sm:$0xff]  ;;  %v635_v8 = vld [vmem:[#allocation7 + $0x8] sm:$0xff]  ;;  %vm642_vm2 = vcmask 261120   ;;  %s1656_s28 = sld [smem:[#allocation16_spill]] }
  0x33   : > { %s1667_s24 = smov (!%p538_p2, %s1343_s24), 1  ;;  %v563_v2 = vld [vmem:[%s1632_s3] sm:$0xf]  ;;  %1006 = vmatpush.msk.msra.mxu0 %vm568_vm0, %v564_v1  ;;  %v634_v9 = vld [vmem:[#allocation7] sm:$0xff]  ;;  %v1133_v17 = vld [vmem:[#allocation6] ss:$0 sm:$0xff] }
  0x34   : > { %s1004_s14 = sshll.u32 %s1667_s24, 3  ;;  %s540_s5 = scalar_lea.vmem %s1629_s0, %s1667_s24  ;;  %1008 = vmatpush.msk.msra.mxu1 %vm568_vm0, %v563_v2  ;;  %v1127_v3 = vld [vmem:[%s465_s19] ss:$0 sm:$0xff]  ;;  %v1129_v11 = vld [vmem:[#allocation4] ss:$0 sm:$0xff]  ;;  %v669_v21 = vld [vmem:[#allocation9 + $0x10] sm:$0xff] }
  0x35   : > { %s547_s21 = scalar_lea.vmem %s1631_s2, %s1004_s14  ;;  %v1128_v4 = vld [vmem:[%s540_s5] ss:$0 sm:$0xff]  ;;  %1007 = vmatmul.msk.f32.vlgmr.msra.gmra.mxu0 %vm565_vm1, %v1127_v3  ;;  %v668_v22 = vld [vmem:[#allocation9 + $0x8] sm:$0xff]  ;;  %v667_v23 = vld [vmem:[#allocation9] sm:$0xff]  ;;  %s1657_s17 = sld [smem:[#allocation15_spill]] }
  0x36   : > { %v555_v5 = vld [vmem:[%s547_s21] sm:$0xff]  ;;  %1009 = vmatmul.msk.f32.vlgmr.msra.gmra.mxu1 %vm565_vm1, %v1128_v4  ;;  %v776_v39 = vld [vmem:[#allocation7 + $0x30] sm:$0xff]  ;;  %v775_v40 = vld [vmem:[#allocation7 + $0x28] sm:$0xff]  ;;  %s1658_s7 = sld [smem:[#allocation17_spill]] }
  0x37   : > { %620 = vperm.xlu0 %1126, %v555_v5   ;;  %v637_v6 = vld [vmem:[#allocation7 + $0x18] sm:$0xff]  ;;  %v774_v41 = vld [vmem:[#allocation7 + $0x20] sm:$0xff]  ;;  %v810_v43 = vld [vmem:[#allocation9 + $0x30] sm:$0xff] }
  0x38   : > { %658 = vmatpush.msra.mxu2 %v637_v6  ;;  %v670_v10 = vld [vmem:[#allocation9 + $0x18] sm:$0xff]  ;;  %v809_v53 = vld [vmem:[#allocation9 + $0x28] sm:$0xff]  ;;  %v808_v54 = vld [vmem:[#allocation9 + $0x20] sm:$0xff] }
  0x39   : > { %690 = vmatpush.msra.mxu3 %v670_v10  ;;  %v1013_v24 = vld [vmem:[%s1633_s4 + $0x4] sm:$0xf]  ;;  %v1134_v26 = vld [vmem:[%s1637_s8] ss:$0 sm:$0xff]  ;;  %v1131_v44 = vld [vmem:[#allocation4 + $0x1] ss:$0 sm:$0xff] }
  0x3a   : > { %659 = vmatpush.msra.mxu2 %v636_v7  ;;  %v1012_v25 = vld [vmem:[%s1632_s3 + $0x4] sm:$0xf]  ;;  %1014 = vmatpush.msk.msrb.mxu0 %vm568_vm0, %v1013_v24  ;;  %v1130_v30 = vld [vmem:[%s1656_s28] ss:$0 sm:$0xff]  ;;  %v1137_v55 = vld [vmem:[%s1637_s8 + $0x1] ss:$0 sm:$0xff] }
  0x3b   : > { %691 = vmatpush.msra.mxu3 %v669_v21  ;;  %1016 = vmatpush.msk.msrb.mxu1 %vm568_vm0, %v1012_v25  ;;  %v1135_v32 = vld [vmem:[%s1657_s17] ss:$0 sm:$0xff]  ;;  %v1136_v49 = vld [vmem:[#allocation6 + $0x1] ss:$0 sm:$0xff]  ;;  %v1132_v59 = vld [vmem:[%s1656_s28 + $0x1] ss:$0 sm:$0xff] }
  0x3c   : > { %660 = vmatpush.msra.mxu2 %v635_v8  ;;  %v777_v38 = vld [vmem:[#allocation7 + $0x38] sm:$0xff]  ;;  %s554_s10 = scalar_lea.vmem %s1658_s7, %s1004_s14 }
  0x3d   : > { %692 = vmatpush.msra.mxu3 %v668_v22  ;;  %1015 = vmatmul.msk.f32.vlgmr.msrb.gmra.mxu0 %vm565_vm1, %v1127_v3  ;;  %v811_v42 = vld [vmem:[#allocation9 + $0x38] sm:$0xff] }
  0x3e   : > { %661 = vmatpush.msra.mxu2 %v634_v9  ;;  %v1138_v61 = vld [vmem:[%s1657_s17 + $0x1] ss:$0 sm:$0xff] }
  0x3f   : > { %693 = vmatpush.msra.mxu3 %v667_v23 }
  0x40   : > { %798 = vmatpush.msrb.mxu2 %v777_v38 }
  0x41   : > { %832 = vmatpush.msrb.mxu3 %v811_v42 }
  0x42   : > { %799 = vmatpush.msrb.mxu2 %v776_v39 }
  0x43   : > { %833 = vmatpush.msrb.mxu3 %v810_v43 }
  0x44   : > { %800 = vmatpush.msrb.mxu2 %v775_v40 }
  0x45   : > { %834 = vmatpush.msrb.mxu3 %v809_v53 }
  0x46   : > { %801 = vmatpush.msrb.mxu2 %v774_v41 }
  0x47   : > { %835 = vmatpush.msrb.mxu3 %v808_v54 }
  0xa9   : > { %v1567_v12 = vpop.permute.xlu0 %620 }
  0xaa   : > { %v626_v13 = vmul.f32 %v1129_v11, %v1567_v12  ;;  %v702_v31 = vmul.f32 %v1130_v30, %v1567_v12  ;;  %v764_v47 = vmul.f32 %v1131_v44, %v1567_v12  ;;  %v845_v60 = vmul.f32 %v1132_v59, %v1567_v12 }
  0xac   : > { %1139 = vtanh.f32 %v702_v31 }
  0xad   : > { %1141 = vtanh.f32 %v845_v60 }
  0xb2   : > { %v589_v14 = vpop.f32.mrf.mxu0  ;;  %v1140_v35 = vpop.eup %1139 }
  0xb3   : > { %v614_v15 = vpop.f32.mrf.mxu1  ;;  %v1142_v0 = vpop.eup %1141 }
  0xb4   : > { %v615_v16 = vadd.f32 %v614_v15, %v589_v14 }
  0xb6   : > { %v627_v18 = vadd.f32 %v626_v13, %v615_v16 }
  0xb8   : > { %v632_v19 = vadd.f32 %v1133_v17, %v627_v18 }
  0xba   : > { %v633_v20 = vmax.f32 %v632_v19, 0.0  ;;  %v730_v45 = vpop.f32.mrf.mxu0 }
  0xbc   : > { %1010 = vmatmul.msk.f32.vlgmr.msra.gmra.mxu2 %vm642_vm2, %v633_v20 }
 0x13f   : > { %v663_v27 = vpop.f32.mrf.mxu2 }
 0x140   : > { %v664_v28 = vadd.f32 %v1134_v26, %v663_v27 }
 0x142   : > { %v666_v29 = vmax.f32 %v664_v28, 0.0 }
 0x144   : > { %1011 = vmatmul.msk.f32.vlgmr.msra.gmra.mxu3 %vm642_vm2, %v666_v29 }
 0x1c7   : > { %v695_v33 = vpop.f32.mrf.mxu3 }
 0x1c8   : > { %v696_v34 = vadd.f32 %v1135_v32, %v695_v33 }
 0x1ca   : > { %v704_v36 = vmul.f32 %v1140_v35, %v696_v34 }
 0x1cc   : > { %v705_v37 = vadd.f32 %v1128_v4, %v704_v36 }
 0x1ce   : > { %1017 = vmatmul.msk.f32.vlgmr.msrb.gmra.mxu1 %vm565_vm1, %v705_v37 }
 0x24b   : > { %v756_v46 = vpop.f32.mrf.mxu1 }
 0x24c   : > { %v757_v48 = vadd.f32 %v756_v46, %v730_v45 }
 0x24e   : > { %v765_v50 = vadd.f32 %v764_v47, %v757_v48 }
 0x250   : > { %v771_v51 = vadd.f32 %v1136_v49, %v765_v50 }
 0x252   : > { %v772_v52 = vmax.f32 %v771_v51, 0.0 }
 0x254   : > { %1019 = vmatmul.msk.f32.vlgmr.msrb.gmra.mxu2 %vm642_vm2, %v772_v52 }
 0x2d7   : > { %v803_v56 = vpop.f32.mrf.mxu2 }
 0x2d8   : > { %v804_v57 = vadd.f32 %v1137_v55, %v803_v56 }
 0x2da   : > { %v806_v58 = vmax.f32 %v804_v57, 0.0 }
 0x2dc   : > { %1021 = vmatmul.msk.f32.vlgmr.msrb.gmra.mxu3 %vm642_vm2, %v806_v58 }
 0x35f   : > { %v837_v62 = vpop.f32.mrf.mxu3 }
 0x360   : > { %v838_v63 = vadd.f32 %v1138_v61, %v837_v62 }
 0x362   : > { %v847_v1 = vmul.f32 %v1142_v0, %v838_v63 }
 0x364   : > { %v848_v2 = vadd.f32 %v847_v1, %v705_v37 }
 0x366   : > { %849 = vst.msk [vmem:[%s554_s10] sm:$0xff] %vm565_vm1, %v848_v2 }
 0x367 PF: > { %s27_s26 = sadd.s32 1, %s1351_s26   ;;  %s1659_s21 = smov %s1335_s22 }
 0x368   : > { %p24_p1 = scmp.ge.s32.totalorder %s27_s26, 4   ;;  %s1660_s22 = smov %s1339_s23 }
 0x369   : > { %s1661_s23 = smov %s1520_s12  ;;  %s1662_s24 = smov %s1347_s25 }
 0x36a   : > { %s1663_s25 = smov %s1665_s18  ;;  %26 = sbr.rel (!%p24_p1) target bundleno = 12 (0xc), region = 139 }
 0x36f   :  { %875 = vsyncpa [#allocation3], 1 }
 0x370   :  { %877 = vsyncpa [#allocation3 + $0x1], 1 }
 0x371   :  { %878 = vsyncpa [#allocation5], 1 }
 0x372   :  { %879 = vsyncpa [#allocation8], 1 }

</bundles_post_ra>
